<compile_context>
chip_gen: v7x
topology: tpu7x:2x2x1
jax: 0.10.0
libtpu: 0.0.40
codegen_flags: <defaults>
</compile_context>

<pallas_src>
import functools

import jax
import jax.numpy as jnp
from jax.experimental import pallas as pl
from jax.experimental.pallas import tpu as pltpu


# ---------------------------------------------------------------------------
# VMEM / tile-size budgeting (byte-based, intermediate-aware, per-generation).
# ---------------------------------------------------------------------------
def _round_up(x: int, m: int) -> int:
    return ((x + m - 1) // m) * m


def _vmem_capacity_bytes() -> int:
    """Per-generation VMEM capacity; falls back to the v7x per-TC minimum."""
    try:
        info = pltpu.get_tpu_info()
        cap = getattr(info, "vmem_capacity_bytes", None)
        if cap:
            return int(cap)
    except Exception:
        pass
    return 64 * 1024 * 1024  # v7x per-TensorCore VMEM; safe lower bound everywhere


def _workset_bytes(tb: int, K: int, C: int, x_itemsize: int, w_itemsize: int,
                   n_live_f32: int = 6) -> int:
    """Estimated VMEM working set: double-buffered x tile, resident weights,
    and the live f32 (tb, C_padded-to-128-lanes) intermediates in the body."""
    c_pad = _round_up(C, 128)
    k_lane = _round_up(K, 128)
    k_sub = _round_up(K, 8)
    ws = 2 * tb * k_lane * x_itemsize          # x tile, double-buffered
    ws += 2 * k_sub * c_pad * w_itemsize       # resident weights (2 bufs, worst case)
    ws += n_live_f32 * tb * c_pad * 4          # logits/shifted/e/p/w/wl chains
    ws += 8 * tb * 4                           # targets + per-sample outputs + slack
    ws += 1 << 20                              # misc (bias, masks, headroom)
    return ws


def _choose_tile_b(B: int, K: int, C: int, x_itemsize: int, w_itemsize: int,
                   budget_bytes: int) -> int:
    """Largest sublane-aligned batch tile whose full working set fits the
    budget, then re-balanced so the ragged last tile is not nearly empty."""
    if B <= 8:
        return B  # block dim == full array dim is always legal
    c_pad = _round_up(C, 128)
    k_lane = _round_up(K, 128)
    k_sub = _round_up(K, 8)
    fixed = 2 * k_sub * c_pad * w_itemsize + (2 << 20)
    per_row = 2 * k_lane * x_itemsize + 6 * c_pad * 4 + 40
    tb = max(8, (max(budget_bytes - fixed, 8 * per_row)) // per_row)
    tb = min(tb, _round_up(B, 8))
    tb = max(8, (tb // 8) * 8)
    # Re-balance: avoid a nearly-empty last grid step.
    num_tiles = pl.cdiv(B, tb)
    tb = _round_up(pl.cdiv(B, num_tiles), 8)
    return tb


# ---------------------------------------------------------------------------
# Kernel: fused linear (MXU) + smoothed focal loss for one batch tile.
# ---------------------------------------------------------------------------
def _fused_focal_kernel(x_ref, w_ref, b_ref, tgt_ref, loss_ref, *,
                        gamma: float, label_smoothing: float,
                        tile_b: int, total_b: int, num_classes: int):
    TB, C = tile_b, num_classes

    # Logits for this batch tile; never round-trip HBM.
    logits = jnp.dot(x_ref[...], w_ref[...],
                     preferred_element_type=jnp.float32)          # (TB, C) f32
    logits = logits + b_ref[...].astype(jnp.float32)

    # Numerically stable softmax / log-softmax.  Only per-element EUP op left
    # is the exp; log + reciprocal are per-row (TB, 1).
    m = jnp.max(logits, axis=1, keepdims=True)                    # (TB, 1)
    shifted = logits - m
    e = jnp.exp(shifted)                                           # (TB, C)
    s = jnp.sum(e, axis=1, keepdims=True)                          # (TB, 1)
    logsoftmax = shifted - jnp.log(s)                              # direct log-softmax
    # NOTE: PyTorch ref uses log(softmax + 1e-10); dropping the epsilon is more
    # accurate and only differs for extreme logits (relaxed tolerance below).

    if float(gamma) == 0.0:
        # gamma == 0 fast path: smoothed CE — skip p / (1-p) / reciprocal.
        wl = logsoftmax
    else:
        p = e * pl.reciprocal(s, approx=True)                      # softmax
        # Clamp: the approximate EUP reciprocal can push p marginally above 1,
        # which would NaN the non-integer jnp.power path.
        one_minus_p = jnp.maximum(1.0 - p, jnp.float32(0.0))
        gi = int(gamma)
        if float(gi) == float(gamma) and 0 < gi <= 8:
            wfoc = one_minus_p                                     # VPU-only fast path
            for _ in range(gi - 1):
                wfoc = wfoc * one_minus_p
        else:
            wfoc = jnp.power(one_minus_p, jnp.float32(gamma))
        wl = wfoc * logsoftmax

    # Smooth one-hot folded directly into the class reduction — no (TB, C)
    # one_hot buffer:  loss = -(off * sum_c wl + (on - off) * wl[target]).
    on = jnp.float32(1.0 - label_smoothing)
    off = jnp.float32(label_smoothing / (C - 1))
    tgt = tgt_ref[...]                                             # (TB, 1) int32
    class_ids = jax.lax.broadcasted_iota(jnp.int32, (TB, C), 1)
    row_sum = jnp.sum(wl, axis=1, keepdims=True)                   # (TB, 1)
    tgt_sum = jnp.sum(jnp.where(class_ids == tgt, wl, jnp.float32(0.0)),
                      axis=1, keepdims=True)                       # (TB, 1)
    per_sample = -(off * row_sum + (on - off) * tgt_sum)           # (TB, 1)

    # Ragged last tile: rows past the true batch read uninitialized VMEM (may
    # be NaN), but the select below drops them — it does not propagate NaN
    # from the unselected branch.
    row = jax.lax.broadcasted_iota(jnp.int32, (TB, 1), 0)
    valid = (pl.program_id(0) * TB + row) < total_b
    loss_ref[...] = jnp.where(valid, per_sample, jnp.float32(0.0))


# ---------------------------------------------------------------------------
# Wrapper: fused flatten+linear model + focal loss, 'mean' reduction.
# ---------------------------------------------------------------------------
def focal_loss_fused(x_flat: jax.Array, w: jax.Array, b: jax.Array,
                     targets: jax.Array, *,
                     gamma: float = 2.0, label_smoothing: float = 0.1) -> jax.Array:
    """x_flat: [B, K] (native dtype), w: [K, C], b: [C], targets: [B] int
    -> scalar f32 mean focal loss (logits computed in-kernel on the MXU)."""
    B, K = x_flat.shape
    K2, C = w.shape
    assert K == K2, (K, K2)
    assert C >= 2, "label_smoothing / (C - 1) requires at least 2 classes"

    targets_2d = targets.astype(jnp.int32).reshape(B, 1)
    bias_2d = b.reshape(1, C)

    capacity = _vmem_capacity_bytes()
    budget = max(8 << 20, (capacity * 2) // 5)     # ~40% of physical VMEM for the working set
    tb = _choose_tile_b(B, K, C, x_flat.dtype.itemsize, w.dtype.itemsize, budget)
    num_tiles = pl.cdiv(B, tb)
    b_pad = num_tiles * tb

    workset = _workset_bytes(tb, K, C, x_flat.dtype.itemsize, w.dtype.itemsize)
    vmem_limit = int(min(capacity - (4 << 20),
                         max(32 << 20, workset + (8 << 20))))
    vmem_limit = max(vmem_limit, 16 << 20)

    kernel = functools.partial(
        _fused_focal_kernel, gamma=gamma, label_smoothing=label_smoothing,
        tile_b=tb, total_b=B, num_classes=C)

    cost = pl.CostEstimate(
        flops=2 * b_pad * K * C + 10 * b_pad * C,
        transcendentals=b_pad * C + 2 * b_pad,
        bytes_accessed=(B * K * x_flat.dtype.itemsize
                        + K * C * w.dtype.itemsize
                        + C * 4 + B * 4 + b_pad * 4))

    per_sample = pl.pallas_call(
        kernel,
        out_shape=jax.ShapeDtypeStruct((b_pad, 1), jnp.float32),
        grid=(num_tiles,),
        in_specs=[
            pl.BlockSpec((tb, K), lambda i: (i, 0)),     # x tile (lane-dense, K full extent)
            pl.BlockSpec((K, C), lambda i: (0, 0)),      # weights resident across all tiles
            pl.BlockSpec((1, C), lambda i: (0, 0)),      # bias resident
            pl.BlockSpec((tb, 1), lambda i: (i, 0)),     # targets tile
        ],
        out_specs=pl.BlockSpec((tb, 1), lambda i: (i, 0)),
        compiler_params=pltpu.CompilerParams(
            # Batch tiles are independent; on v7x this lets both TensorCores run.
            # TODO(synk): verify core sharding in a trace; switch to
            # pltpu.CORE_PARALLEL if one v7x core sits idle.
            dimension_semantics=("parallel",),
            vmem_limit_bytes=vmem_limit),
        cost_estimate=cost,
    )(x_flat, w, bias_2d, targets_2d)

    # 'mean' reduction over the GLOBAL batch size (tiny; done in JAX).
    return jnp.sum(per_sample[:B, 0]) / jnp.float32(B)


# ---------------------------------------------------------------------------
# Glue: deterministic "model" params (flatten + linear) and a pure-JAX ref.
# `_FocalLoss` itself owns no parameters; the concrete linear model is what
# gets fused into the kernel.
# ---------------------------------------------------------------------------
def make_model_params(key, in_features: int, num_classes: int):
    kw, kb = jax.random.split(key)
    w = jax.random.normal(kw, (in_features, num_classes), jnp.float32) * 0.02
    b = jax.random.normal(kb, (num_classes,), jnp.float32) * 0.01
    return w, b


def model_apply(params, x_nchw):
    w, b = params
    x_flat = x_nchw.reshape(x_nchw.shape[0], -1)
    return x_flat @ w + b   # logits [B, C]


def focal_loss_ref(logits, targets, *, gamma, label_smoothing, num_classes):
    one_hot = jnp.full((logits.shape[0], num_classes),
                       label_smoothing / (num_classes - 1), jnp.float32)
    one_hot = one_hot.at[jnp.arange(logits.shape[0]), targets].set(1.0 - label_smoothing)
    softmax = jax.nn.softmax(logits.astype(jnp.float32), axis=1)
    logsoftmax = jnp.log(softmax + 1e-10)
    loss = -jnp.sum(one_hot * (1.0 - softmax) ** gamma * logsoftmax, axis=1)
    return jnp.mean(loss)


if __name__ == "__main__":
    # Hyper-params (what args would carry): no augmentation branch.
    NUM_CLASSES = 10
    GAMMA = 2.0
    LABEL_SMOOTHING = 0.1

    B, Cin, H, W = 8, 4, 16, 16
    key = jax.random.PRNGKey(0)
    kx, kt, kp = jax.random.split(key, 3)

    x = jax.random.normal(kx, (B, Cin, H, W), jnp.float32)           # NCHW input
    targets = jax.random.randint(kt, (B,), 0, NUM_CLASSES, jnp.int32)
    w, b = make_model_params(kp, Cin * H * W, NUM_CLASSES)

    # Fused model + loss: the flatten happens in the wrapper; the matmul, bias,
    # softmax and focal weighting all happen inside the Pallas kernel.
    loss = focal_loss_fused(x.reshape(B, -1), w, b, targets,
                            gamma=GAMMA, label_smoothing=LABEL_SMOOTHING)
    loss = jax.block_until_ready(loss)

    logits_ref = model_apply((w, b), x)
    ref = focal_loss_ref(logits_ref, targets, gamma=GAMMA,
                         label_smoothing=LABEL_SMOOTHING, num_classes=NUM_CLASSES)
    # Tolerance covers the approx EUP reciprocal and the dropped +1e-10 epsilon.
    assert jnp.allclose(loss, ref, rtol=5e-3, atol=5e-4), (loss, ref)

    # TODO(synk): mixup/cutmix augmentation branches (host-side beta draws,
    # random permutation, model re-invocation) are host control flow and are
    # intentionally left outside the kernel.
    print("KERNEL_OK")
</pallas_src>

<mosaic_0001>
module attributes {stable_mosaic.version = 11 : i64} {
  func.func @_fused_focal_kernel(%arg0: i32, %arg1: memref<8x1024xf32, #tpu.memory_space<vmem>>, %arg2: memref<1024x10xf32, #tpu.memory_space<vmem>>, %arg3: memref<1x10xf32, #tpu.memory_space<vmem>>, %arg4: memref<8x1xi32, #tpu.memory_space<vmem>>, %arg5: memref<8x1xf32, #tpu.memory_space<vmem>>) attributes {dimension_semantics = [#tpu.dimension_semantics<parallel>], iteration_bounds = array<i64: 1>, scalar_prefetch = 0 : i64, scratch_operands = 0 : i64, tpu.core_type = #tpu.core_type<tc>, window_params = [{transform_indices = @transform_0, window_bounds = array<i64: 8, 1024>}, {pipeline_mode = #tpu.pipeline_mode<synchronous>, transform_indices = @transform_1, window_bounds = array<i64: 1024, 10>}, {pipeline_mode = #tpu.pipeline_mode<synchronous>, transform_indices = @transform_2, window_bounds = array<i64: 1, 10>}, {transform_indices = @transform_3, window_bounds = array<i64: 8, 1>}, {transform_indices = @transform_4, window_bounds = array<i64: 8, 1>}]} {
    %c0 = arith.constant 0 : index
    %c0_0 = arith.constant 0 : index
    %0 = vector.load %arg1[%c0, %c0_0] : memref<8x1024xf32, #tpu.memory_space<vmem>>, vector<8x1024xf32>
    %c0_1 = arith.constant 0 : index
    %c0_2 = arith.constant 0 : index
    %1 = vector.load %arg2[%c0_1, %c0_2] : memref<1024x10xf32, #tpu.memory_space<vmem>>, vector<1024x10xf32>
    %cst = arith.constant dense<0.000000e+00> : vector<8x10xf32>
    %2 = tpu.matmul %0, %1, %cst {dimension_numbers = #tpu.dot_dimension_numbers<[1], [0], [0], [1], [0, 0, 1, 1], [], []>} : vector<8x1024xf32>, vector<1024x10xf32>, vector<8x10xf32> -> vector<8x10xf32>
    %c0_3 = arith.constant 0 : index
    %c0_4 = arith.constant 0 : index
    %3 = vector.load %arg3[%c0_3, %c0_4] : memref<1x10xf32, #tpu.memory_space<vmem>>, vector<1x10xf32>
    %4 = vector.broadcast %3 : vector<1x10xf32> to vector<8x10xf32>
    %5 = arith.addf %2, %4 : vector<8x10xf32>
    %cst_5 = arith.constant dense<0xFF800000> : vector<8xf32>
    %6 = vector.multi_reduction <maximumf>, %5, %cst_5 [1] : vector<8x10xf32> to vector<8xf32>
    %7 = vector.shape_cast %6 : vector<8xf32> to vector<8x1xf32>
    %8 = vector.broadcast %7 : vector<8x1xf32> to vector<8x10xf32>
    %9 = arith.subf %5, %8 : vector<8x10xf32>
    %10 = math.exp %9 : vector<8x10xf32>
    %cst_6 = arith.constant dense<0.000000e+00> : vector<8xf32>
    %11 = vector.multi_reduction <add>, %10, %cst_6 [1] : vector<8x10xf32> to vector<8xf32>
    %12 = vector.shape_cast %11 : vector<8xf32> to vector<8x1xf32>
    %13 = math.log %12 : vector<8x1xf32>
    %14 = vector.broadcast %13 : vector<8x1xf32> to vector<8x10xf32>
    %15 = arith.subf %9, %14 : vector<8x10xf32>
    %16 = tpu.reciprocal %12 {approx = true} : vector<8x1xf32> -> vector<8x1xf32>
    %17 = vector.broadcast %16 : vector<8x1xf32> to vector<8x10xf32>
    %18 = arith.mulf %10, %17 : vector<8x10xf32>
    %cst_7 = arith.constant 1.000000e+00 : f32
    %19 = vector.broadcast %cst_7 : f32 to vector<8x10xf32>
    %20 = arith.subf %19, %18 : vector<8x10xf32>
    %cst_8 = arith.constant 0.000000e+00 : f32
    %21 = vector.broadcast %cst_8 : f32 to vector<8x10xf32>
    %22 = arith.maximumf %20, %21 : vector<8x10xf32>
    %23 = arith.mulf %22, %22 : vector<8x10xf32>
    %24 = arith.mulf %23, %15 : vector<8x10xf32>
    %c0_9 = arith.constant 0 : index
    %c0_10 = arith.constant 0 : index
    %25 = vector.load %arg4[%c0_9, %c0_10] : memref<8x1xi32, #tpu.memory_space<vmem>>, vector<8x1xi32>
    %26 = tpu.iota {dimensions = array<i32: 1>} : vector<8x10xi32>
    %cst_11 = arith.constant dense<0.000000e+00> : vector<8xf32>
    %27 = vector.multi_reduction <add>, %24, %cst_11 [1] : vector<8x10xf32> to vector<8xf32>
    %28 = vector.shape_cast %27 : vector<8xf32> to vector<8x1xf32>
    %29 = vector.broadcast %25 : vector<8x1xi32> to vector<8x10xi32>
    %30 = arith.cmpi eq, %26, %29 : vector<8x10xi32>
    %cst_12 = arith.constant 0.000000e+00 : f32
    %31 = vector.broadcast %cst_12 : f32 to vector<8x10xf32>
    %32 = arith.select %30, %24, %31 : vector<8x10xi1>, vector<8x10xf32>
    %cst_13 = arith.constant dense<0.000000e+00> : vector<8xf32>
    %33 = vector.multi_reduction <add>, %32, %cst_13 [1] : vector<8x10xf32> to vector<8xf32>
    %34 = vector.shape_cast %33 : vector<8xf32> to vector<8x1xf32>
    %cst_14 = arith.constant 0.0111111114 : f32
    %35 = vector.broadcast %cst_14 : f32 to vector<8x1xf32>
    %36 = arith.mulf %35, %28 : vector<8x1xf32>
    %cst_15 = arith.constant 0.899999976 : f32
    %cst_16 = arith.constant 0.0111111114 : f32
    %37 = arith.subf %cst_15, %cst_16 : f32
    %38 = vector.broadcast %37 : f32 to vector<8x1xf32>
    %39 = arith.mulf %38, %34 : vector<8x1xf32>
    %40 = arith.addf %36, %39 : vector<8x1xf32>
    %cst_17 = arith.constant 0.000000e+00 : f32
    %41 = vector.broadcast %cst_17 : f32 to vector<8x1xf32>
    %42 = arith.subf %41, %40 : vector<8x1xf32>
    %43 = tpu.iota {dimensions = array<i32: 0>} : vector<8x1xi32>
    %c8_i32 = arith.constant 8 : i32
    %44 = arith.muli %arg0, %c8_i32 : i32
    %45 = vector.broadcast %44 : i32 to vector<8x1xi32>
    %46 = arith.addi %45, %43 : vector<8x1xi32>
    %c8_i32_18 = arith.constant 8 : i32
    %47 = vector.broadcast %c8_i32_18 : i32 to vector<8x1xi32>
    %48 = arith.cmpi slt, %46, %47 : vector<8x1xi32>
    %cst_19 = arith.constant 0.000000e+00 : f32
    %49 = vector.broadcast %cst_19 : f32 to vector<8x1xf32>
    %50 = arith.select %48, %42, %49 : vector<8x1xi1>, vector<8x1xf32>
    %c0_20 = arith.constant 0 : index
    %c0_21 = arith.constant 0 : index
    %51 = vector.load %arg5[%c0_20, %c0_21] : memref<8x1xf32, #tpu.memory_space<vmem>>, vector<8x1xf32>
    tpu.vector_store %arg5[%c0_20, %c0_21], %50 {strides = array<i32>} : memref<8x1xf32, #tpu.memory_space<vmem>>, vector<8x1xf32>,
    return
  }
  func.func @transform_0(%arg0: i32) -> (i32, i32) {
    %c0_i32 = arith.constant 0 : i32
    %c0_i32_0 = arith.constant 0 : i32
    return %arg0, %c0_i32 : i32, i32
  }
  func.func @transform_1(%arg0: i32) -> (i32, i32) {
    %c0_i32 = arith.constant 0 : i32
    %c0_i32_0 = arith.constant 0 : i32
    %c0_i32_1 = arith.constant 0 : i32
    return %c0_i32, %c0_i32_0 : i32, i32
  }
  func.func @transform_2(%arg0: i32) -> (i32, i32) {
    %c0_i32 = arith.constant 0 : i32
    %c0_i32_0 = arith.constant 0 : i32
    %c0_i32_1 = arith.constant 0 : i32
    return %c0_i32, %c0_i32_0 : i32, i32
  }
  func.func @transform_3(%arg0: i32) -> (i32, i32) {
    %c0_i32 = arith.constant 0 : i32
    %c0_i32_0 = arith.constant 0 : i32
    return %arg0, %c0_i32 : i32, i32
  }
  func.func @transform_4(%arg0: i32) -> (i32, i32) {
    %c0_i32 = arith.constant 0 : i32
    %c0_i32_0 = arith.constant 0 : i32
    return %arg0, %c0_i32 : i32, i32
  }
}

</mosaic_0001>

<bundles_post_ra>
// kernel: tpu_custom_call.1
= control target key start
LH: loop header
LB: loop body
LE: loop exit
PB: predicated region body
PF: predicated region fallthrough
CT: control target
= control target key end

     0   :  { %vm440_vm0 = vcmask 80896   ;;  %vm484_vm2 = vcmask 7168   ;;  %s1215_s1 = inlined_call_operand.vmem [shape: f32[1024,10], index: 1, kind: input, shape index: {}]   ;;  %s1216_s0 = inlined_call_operand.vmem [shape: f32[8,1024], index: 0, kind: input, shape index: {}]   ;;  %s1217_s2 = inlined_call_operand.vmem [shape: f32[1,10], index: 2, kind: input, shape index: {}]   ;;  %s1218_s3 = inlined_call_operand.vmem [shape: s32[8,1], index: 3, kind: input, shape index: {}]   ;;  %s1219_s4 = inlined_call_operand.vmem [shape: f32[8,1], index: 4, kind: output, shape index: {}]  }
   0x1   :  { %v41_v0 = vld [vmem:[%s1215_s1 + $0x80] sm:$0xff]  ;;  %v42_v1 = vld [vmem:[%s1215_s1 + $0x88] sm:$0xff]  ;;  %v43_v11 = vld [vmem:[%s1215_s1 + $0x90] sm:$0xff] }
   0x2   :  { %v25_v2 = vld [vmem:[%s1215_s1] sm:$0xff]  ;;  %v631_v3 = vpack.c.bf16 %v42_v1, %v41_v0  ;;  %v26_v4 = vld [vmem:[%s1215_s1 + $0x8] sm:$0xff]  ;;  %v44_v13 = vld [vmem:[%s1215_s1 + $0x98] sm:$0xff] }
   0x3   :  { %v73_v5 = vld [vmem:[%s1215_s1 + $0x180] sm:$0xff]  ;;  %v74_v6 = vld [vmem:[%s1215_s1 + $0x188] sm:$0xff]  ;;  %v633_v7 = vpack.c.bf16 %v26_v4, %v25_v2  ;;  %v27_v14 = vld [vmem:[%s1215_s1 + $0x10] sm:$0xff]  ;;  %v635_v16 = vpack.c.bf16 %v44_v13, %v43_v11 }
   0x4   :  { %v663_v8 = vpack.c.bf16 %v74_v6, %v73_v5  ;;  %v57_v9 = vld [vmem:[%s1215_s1 + $0x100] sm:$0xff]  ;;  %v58_v10 = vld [vmem:[%s1215_s1 + $0x108] sm:$0xff]  ;;  %632 = vmatprep.subr.bf16.mxu0 %v631_v3  ;;  %v28_v15 = vld [vmem:[%s1215_s1 + $0x18] sm:$0xff] }
   0x5   :  { %v665_v12 = vpack.c.bf16 %v58_v10, %v57_v9  ;;  %634 = vmatpush3.bf16.msra.mxu0 %v633_v7  ;;  %v637_v17 = vpack.c.bf16 %v28_v15, %v27_v14  ;;  %v75_v18 = vld [vmem:[%s1215_s1 + $0x190] sm:$0xff]  ;;  %v76_v19 = vld [vmem:[%s1215_s1 + $0x198] sm:$0xff]  ;;  %v45_v23 = vld [vmem:[%s1215_s1 + $0xa0] sm:$0xff] }
   0x6   :  { %664 = vmatprep.subr.bf16.mxu1 %v663_v8  ;;  %v59_v20 = vld [vmem:[%s1215_s1 + $0x110] sm:$0xff]  ;;  %v667_v21 = vpack.c.bf16 %v76_v19, %v75_v18  ;;  %v60_v22 = vld [vmem:[%s1215_s1 + $0x118] sm:$0xff]  ;;  %v46_v24 = vld [vmem:[%s1215_s1 + $0xa8] sm:$0xff]  ;;  %636 = vmatprep.subr.bf16.mxu0 %v635_v16 }
   0x7   :  { %666 = vmatpush3.bf16.msra.mxu1 %v665_v12  ;;  %v669_v25 = vpack.c.bf16 %v60_v22, %v59_v20  ;;  %v639_v26 = vpack.c.bf16 %v46_v24, %v45_v23  ;;  %v29_v27 = vld [vmem:[%s1215_s1 + $0x20] sm:$0xff]  ;;  %v30_v28 = vld [vmem:[%s1215_s1 + $0x28] sm:$0xff]  ;;  %v47_v35 = vld [vmem:[%s1215_s1 + $0xb0] sm:$0xff] }
   0x8   :  { %v77_v29 = vld [vmem:[%s1215_s1 + $0x1a0] sm:$0xff]  ;;  %668 = vmatprep.subr.bf16.mxu1 %v667_v21  ;;  %v78_v30 = vld [vmem:[%s1215_s1 + $0x1a8] sm:$0xff]  ;;  %v641_v33 = vpack.c.bf16 %v30_v28, %v29_v27  ;;  %v48_v36 = vld [vmem:[%s1215_s1 + $0xb8] sm:$0xff] }
   0x9   :  { %v61_v31 = vld [vmem:[%s1215_s1 + $0x120] sm:$0xff]  ;;  %v62_v32 = vld [vmem:[%s1215_s1 + $0x128] sm:$0xff]  ;;  %638 = vmatpush3.bf16.msra.mxu0 %v637_v17  ;;  %v671_v34 = vpack.c.bf16 %v78_v30, %v77_v29  ;;  %v31_v37 = vld [vmem:[%s1215_s1 + $0x30] sm:$0xff]  ;;  %v643_v39 = vpack.c.bf16 %v48_v36, %v47_v35 }
   0xa   :  { %640 = vmatprep.subr.bf16.mxu0 %v639_v26  ;;  %v673_v38 = vpack.c.bf16 %v62_v32, %v61_v31  ;;  %v32_v40 = vld [vmem:[%s1215_s1 + $0x38] sm:$0xff]  ;;  %v79_v41 = vld [vmem:[%s1215_s1 + $0x1b0] sm:$0xff]  ;;  %v49_v46 = vld [vmem:[%s1215_s1 + $0xc0] sm:$0xff] }
   0xb   :  { %670 = vmatpush3.bf16.msra.mxu1 %v669_v25  ;;  %v80_v42 = vld [vmem:[%s1215_s1 + $0x1b8] sm:$0xff]  ;;  %v63_v44 = vld [vmem:[%s1215_s1 + $0x130] sm:$0xff]  ;;  %v50_v47 = vld [vmem:[%s1215_s1 + $0xc8] sm:$0xff]  ;;  %v645_v48 = vpack.c.bf16 %v32_v40, %v31_v37 }
   0xc   :  { %672 = vmatprep.subr.bf16.mxu1 %v671_v34  ;;  %v675_v43 = vpack.c.bf16 %v80_v42, %v79_v41  ;;  %v64_v45 = vld [vmem:[%s1215_s1 + $0x138] sm:$0xff]  ;;  %v81_v49 = vld [vmem:[%s1215_s1 + $0x1c0] sm:$0xff]  ;;  %v82_v50 = vld [vmem:[%s1215_s1 + $0x1c8] sm:$0xff]  ;;  %v647_v52 = vpack.c.bf16 %v50_v47, %v49_v46 }
   0xd   :  { %642 = vmatpush3.bf16.msra.mxu0 %v641_v33  ;;  %v677_v51 = vpack.c.bf16 %v64_v45, %v63_v44  ;;  %v33_v53 = vld [vmem:[%s1215_s1 + $0x40] sm:$0xff]  ;;  %v34_v54 = vld [vmem:[%s1215_s1 + $0x48] sm:$0xff]  ;;  %v679_v56 = vpack.c.bf16 %v82_v50, %v81_v49  ;;  %v51_v58 = vld [vmem:[%s1215_s1 + $0xd0] sm:$0xff] }
   0xe   :  { %644 = vmatprep.subr.bf16.mxu0 %v643_v39  ;;  %v65_v55 = vld [vmem:[%s1215_s1 + $0x140] sm:$0xff]  ;;  %v66_v57 = vld [vmem:[%s1215_s1 + $0x148] sm:$0xff]  ;;  %v52_v59 = vld [vmem:[%s1215_s1 + $0xd8] sm:$0xff]  ;;  %v649_v62 = vpack.c.bf16 %v34_v54, %v33_v53 }
   0xf   :  { %674 = vmatpush3.bf16.msra.mxu1 %v673_v38  ;;  %v83_v60 = vld [vmem:[%s1215_s1 + $0x1d0] sm:$0xff]  ;;  %v84_v61 = vld [vmem:[%s1215_s1 + $0x1d8] sm:$0xff]  ;;  %v681_v63 = vpack.c.bf16 %v66_v57, %v65_v55  ;;  %v651_v0 = vpack.c.bf16 %v52_v59, %v51_v58  ;;  %v53_v6 = vld [vmem:[%s1215_s1 + $0xe0] sm:$0xff] }
  0x10   :  { %676 = vmatprep.subr.bf16.mxu1 %v675_v43  ;;  %v35_v1 = vld [vmem:[%s1215_s1 + $0x50] sm:$0xff]  ;;  %v36_v2 = vld [vmem:[%s1215_s1 + $0x58] sm:$0xff]  ;;  %v683_v4 = vpack.c.bf16 %v84_v61, %v83_v60  ;;  %v54_v7 = vld [vmem:[%s1215_s1 + $0xe8] sm:$0xff] }
  0x11   :  { %646 = vmatpush3.bf16.msra.mxu0 %v645_v48  ;;  %v67_v3 = vld [vmem:[%s1215_s1 + $0x150] sm:$0xff]  ;;  %v68_v5 = vld [vmem:[%s1215_s1 + $0x158] sm:$0xff]  ;;  %v85_v8 = vld [vmem:[%s1215_s1 + $0x1e0] sm:$0xff]  ;;  %v653_v10 = vpack.c.bf16 %v36_v2, %v35_v1  ;;  %v655_v14 = vpack.c.bf16 %v54_v7, %v53_v6 }
  0x12   :  { %648 = vmatprep.subr.bf16.mxu0 %v647_v52  ;;  %v86_v9 = vld [vmem:[%s1215_s1 + $0x1e8] sm:$0xff]  ;;  %v37_v11 = vld [vmem:[%s1215_s1 + $0x60] sm:$0xff]  ;;  %v685_v13 = vpack.c.bf16 %v68_v5, %v67_v3  ;;  %v55_v19 = vld [vmem:[%s1215_s1 + $0xf0] sm:$0xff] }
  0x13   :  { %678 = vmatpush3.bf16.msra.mxu1 %v677_v51  ;;  %v38_v12 = vld [vmem:[%s1215_s1 + $0x68] sm:$0xff]  ;;  %v69_v15 = vld [vmem:[%s1215_s1 + $0x160] sm:$0xff]  ;;  %v687_v18 = vpack.c.bf16 %v86_v9, %v85_v8  ;;  %v56_v20 = vld [vmem:[%s1215_s1 + $0xf8] sm:$0xff] }
  0x14   :  { %680 = vmatprep.subr.bf16.mxu1 %v679_v56  ;;  %v70_v16 = vld [vmem:[%s1215_s1 + $0x168] sm:$0xff]  ;;  %v20_v21 = vld [vmem:[%s1216_s0 + $0x18] sm:$0xff]  ;;  %v87_v22 = vld [vmem:[%s1215_s1 + $0x1f0] sm:$0xff]  ;;  %v657_v24 = vpack.c.bf16 %v38_v12, %v37_v11  ;;  %v659_v26 = vpack.c.bf16 %v56_v20, %v55_v19 }
  0x15   :  { %650 = vmatpush3.bf16.msra.mxu0 %v649_v62  ;;  %v18_v17 = vld [vmem:[%s1216_s0 + $0x8] sm:$0xff]  ;;  %v88_v23 = vld [vmem:[%s1215_s1 + $0x1f8] sm:$0xff]  ;;  %294 = vmatprep.mubr.f32.mxu1 %v20_v21  ;;  %v689_v25 = vpack.c.bf16 %v70_v16, %v69_v15  ;;  %v39_v27 = vld [vmem:[%s1215_s1 + $0x70] sm:$0xff] }
  0x16   :  { %652 = vmatprep.subr.bf16.mxu0 %v651_v0  ;;  %224 = vmatprep.mubr.f32.mxu0 %v18_v17  ;;  %v40_v28 = vld [vmem:[%s1215_s1 + $0x78] sm:$0xff]  ;;  %v71_v29 = vld [vmem:[%s1215_s1 + $0x170] sm:$0xff]  ;;  %v691_v30 = vpack.c.bf16 %v88_v23, %v87_v22  ;;  %v105_v32 = vld [vmem:[%s1215_s1 + $0x280] sm:$0xff] }
  0x17   :  { %682 = vmatpush3.bf16.msra.mxu1 %v681_v63  ;;  %v72_v31 = vld [vmem:[%s1215_s1 + $0x178] sm:$0xff]  ;;  %v106_v33 = vld [vmem:[%s1215_s1 + $0x288] sm:$0xff]  ;;  %v137_v34 = vld [vmem:[%s1215_s1 + $0x380] sm:$0xff]  ;;  %v661_v36 = vpack.c.bf16 %v40_v28, %v39_v27 }
  0x18   :  { %684 = vmatprep.subr.bf16.mxu1 %v683_v4  ;;  %v138_v35 = vld [vmem:[%s1215_s1 + $0x388] sm:$0xff]  ;;  %v693_v37 = vpack.c.bf16 %v72_v31, %v71_v29  ;;  %v695_v38 = vpack.c.bf16 %v106_v33, %v105_v32  ;;  %v89_v39 = vld [vmem:[%s1215_s1 + $0x200] sm:$0xff]  ;;  %v107_v44 = vld [vmem:[%s1215_s1 + $0x290] sm:$0xff] }
  0x19   :  { %654 = vmatpush3.bf16.msra.mxu0 %v653_v10  ;;  %v90_v40 = vld [vmem:[%s1215_s1 + $0x208] sm:$0xff]  ;;  %v121_v41 = vld [vmem:[%s1215_s1 + $0x300] sm:$0xff]  ;;  %v727_v42 = vpack.c.bf16 %v138_v35, %v137_v34  ;;  %v108_v45 = vld [vmem:[%s1215_s1 + $0x298] sm:$0xff] }
  0x1a   :  { %656 = vmatprep.subr.bf16.mxu0 %v655_v14  ;;  %v122_v43 = vld [vmem:[%s1215_s1 + $0x308] sm:$0xff]  ;;  %v139_v46 = vld [vmem:[%s1215_s1 + $0x390] sm:$0xff]  ;;  %v140_v47 = vld [vmem:[%s1215_s1 + $0x398] sm:$0xff]  ;;  %v697_v49 = vpack.c.bf16 %v90_v40, %v89_v39  ;;  %v699_v52 = vpack.c.bf16 %v108_v45, %v107_v44 }
  0x1b   :  { %686 = vmatpush3.bf16.msra.mxu1 %v685_v13  ;;  %v17_v48 = vld [vmem:[%s1216_s0] sm:$0xff]  ;;  %v19_v50 = vld [vmem:[%s1216_s0 + $0x10] sm:$0xff]  ;;  %v729_v51 = vpack.c.bf16 %v122_v43, %v121_v41  ;;  %v92_v54 = vld [vmem:[%s1215_s1 + $0x218] sm:$0xff]  ;;  %v731_v56 = vpack.c.bf16 %v140_v47, %v139_v46 }
  0x1c   :  { %688 = vmatprep.subr.bf16.mxu1 %v687_v18  ;;  %v91_v53 = vld [vmem:[%s1215_s1 + $0x210] sm:$0xff]  ;;  %v124_v57 = vld [vmem:[%s1215_s1 + $0x318] sm:$0xff]  ;;  %v109_v58 = vld [vmem:[%s1215_s1 + $0x2a0] sm:$0xff] }
  0x1d   :  { %658 = vmatpush3.bf16.msra.mxu0 %v657_v24  ;;  %v123_v55 = vld [vmem:[%s1215_s1 + $0x310] sm:$0xff]  ;;  %v110_v59 = vld [vmem:[%s1215_s1 + $0x2a8] sm:$0xff]  ;;  %v141_v60 = vld [vmem:[%s1215_s1 + $0x3a0] sm:$0xff]  ;;  %v701_v62 = vpack.c.bf16 %v92_v54, %v91_v53 }
  0x1e   :  { %660 = vmatprep.subr.bf16.mxu0 %v659_v26  ;;  %v142_v61 = vld [vmem:[%s1215_s1 + $0x3a8] sm:$0xff]  ;;  %v733_v63 = vpack.c.bf16 %v124_v57, %v123_v55  ;;  %v703_v0 = vpack.c.bf16 %v110_v59, %v109_v58  ;;  %v93_v1 = vld [vmem:[%s1215_s1 + $0x220] sm:$0xff]  ;;  %v111_v6 = vld [vmem:[%s1215_s1 + $0x2b0] sm:$0xff] }
  0x1f   :  { %690 = vmatpush3.bf16.msra.mxu1 %v689_v25  ;;  %v94_v2 = vld [vmem:[%s1215_s1 + $0x228] sm:$0xff]  ;;  %v125_v3 = vld [vmem:[%s1215_s1 + $0x320] sm:$0xff]  ;;  %v735_v4 = vpack.c.bf16 %v142_v61, %v141_v60  ;;  %v112_v7 = vld [vmem:[%s1215_s1 + $0x2b8] sm:$0xff] }
  0x20   :  { %692 = vmatprep.subr.bf16.mxu1 %v691_v30  ;;  %v126_v5 = vld [vmem:[%s1215_s1 + $0x328] sm:$0xff]  ;;  %v143_v8 = vld [vmem:[%s1215_s1 + $0x3b0] sm:$0xff]  ;;  %v144_v9 = vld [vmem:[%s1215_s1 + $0x3b8] sm:$0xff]  ;;  %v705_v10 = vpack.c.bf16 %v94_v2, %v93_v1  ;;  %v707_v12 = vpack.c.bf16 %v112_v7, %v111_v6 }
  0x21   :  { %662 = vmatpush3.bf16.msra.mxu0 %v661_v36  ;;  %v737_v11 = vpack.c.bf16 %v126_v5, %v125_v3  ;;  %v95_v13 = vld [vmem:[%s1215_s1 + $0x230] sm:$0xff]  ;;  %v96_v14 = vld [vmem:[%s1215_s1 + $0x238] sm:$0xff]  ;;  %v739_v16 = vpack.c.bf16 %v144_v9, %v143_v8  ;;  %v113_v18 = vld [vmem:[%s1215_s1 + $0x2c0] sm:$0xff] }
  0x22   :  { %696 = vmatprep.subr.bf16.mxu0 %v695_v38  ;;  %v127_v15 = vld [vmem:[%s1215_s1 + $0x330] sm:$0xff]  ;;  %v128_v17 = vld [vmem:[%s1215_s1 + $0x338] sm:$0xff]  ;;  %v114_v19 = vld [vmem:[%s1215_s1 + $0x2c8] sm:$0xff]  ;;  %v709_v22 = vpack.c.bf16 %v96_v14, %v95_v13 }
  0x23   :  { %694 = vmatpush3.bf16.msra.mxu1 %v693_v37  ;;  %v145_v20 = vld [vmem:[%s1215_s1 + $0x3c0] sm:$0xff]  ;;  %v146_v21 = vld [vmem:[%s1215_s1 + $0x3c8] sm:$0xff]  ;;  %v24_v24 = vld [vmem:[%s1216_s0 + $0x38] sm:$0xff]  ;;  %v741_v25 = vpack.c.bf16 %v128_v17, %v127_v15  ;;  %v711_v26 = vpack.c.bf16 %v114_v19, %v113_v18 }
  0x24   :  { %728 = vmatprep.subr.bf16.mxu1 %v727_v42  ;;  %225 = vmatmul.mubr.f32.vlgmr.msra.gmra.mrb[0].mxu0 %v17_v48  ;;  %v22_v23 = vld [vmem:[%s1216_s0 + $0x28] sm:$0xff]  ;;  %v97_v27 = vld [vmem:[%s1215_s1 + $0x240] sm:$0xff]  ;;  %v743_v30 = vpack.c.bf16 %v146_v21, %v145_v20  ;;  %v115_v32 = vld [vmem:[%s1215_s1 + $0x2d0] sm:$0xff] }
  0x25   :  { %698 = vmatpush3.bf16.msra.mxu0 %v697_v49  ;;  %v98_v28 = vld [vmem:[%s1215_s1 + $0x248] sm:$0xff]  ;;  %v129_v29 = vld [vmem:[%s1215_s1 + $0x340] sm:$0xff]  ;;  %v116_v33 = vld [vmem:[%s1215_s1 + $0x2d8] sm:$0xff]  ;;  %364 = vmatprep.mubr.f32.mxu0 %v22_v23 }
  0x26   :  { %295 = vmatmul.mubr.f32.vlgmr.msra.gmra.mrb[0].mxu1 %v19_v50  ;;  %700 = vmatprep.subr.bf16.mxu0 %v699_v52  ;;  %v130_v31 = vld [vmem:[%s1215_s1 + $0x348] sm:$0xff]  ;;  %v147_v34 = vld [vmem:[%s1215_s1 + $0x3d0] sm:$0xff]  ;;  %v148_v35 = vld [vmem:[%s1215_s1 + $0x3d8] sm:$0xff]  ;;  %v713_v36 = vpack.c.bf16 %v98_v28, %v97_v27  ;;  %v715_v38 = vpack.c.bf16 %v116_v33, %v115_v32 }
  0x27   :  { %730 = vmatpush3.bf16.msra.mxu1 %v729_v51  ;;  %434 = vmatprep.mubr.f32.mxu1 %v24_v24  ;;  %v745_v37 = vpack.c.bf16 %v130_v31, %v129_v29  ;;  %v99_v39 = vld [vmem:[%s1215_s1 + $0x250] sm:$0xff]  ;;  %v100_v40 = vld [vmem:[%s1215_s1 + $0x258] sm:$0xff]  ;;  %v747_v42 = vpack.c.bf16 %v148_v35, %v147_v34  ;;  %v117_v44 = vld [vmem:[%s1215_s1 + $0x2e0] sm:$0xff] }
  0x28   :  { %732 = vmatprep.subr.bf16.mxu1 %v731_v56  ;;  %v131_v41 = vld [vmem:[%s1215_s1 + $0x350] sm:$0xff]  ;;  %v132_v43 = vld [vmem:[%s1215_s1 + $0x358] sm:$0xff]  ;;  %v118_v45 = vld [vmem:[%s1215_s1 + $0x2e8] sm:$0xff]  ;;  %v717_v48 = vpack.c.bf16 %v100_v40, %v99_v39 }
  0x29   :  { %702 = vmatpush3.bf16.msra.mxu0 %v701_v62  ;;  %v149_v46 = vld [vmem:[%s1215_s1 + $0x3e0] sm:$0xff]  ;;  %v150_v47 = vld [vmem:[%s1215_s1 + $0x3e8] sm:$0xff]  ;;  %v749_v49 = vpack.c.bf16 %v132_v43, %v131_v41  ;;  %v719_v50 = vpack.c.bf16 %v118_v45, %v117_v44  ;;  %v119_v56 = vld [vmem:[%s1215_s1 + $0x2f0] sm:$0xff] }
  0x2a   :  { %704 = vmatprep.subr.bf16.mxu0 %v703_v0  ;;  %v101_v51 = vld [vmem:[%s1215_s1 + $0x260] sm:$0xff]  ;;  %v102_v52 = vld [vmem:[%s1215_s1 + $0x268] sm:$0xff]  ;;  %v751_v54 = vpack.c.bf16 %v150_v47, %v149_v46  ;;  %v120_v57 = vld [vmem:[%s1215_s1 + $0x2f8] sm:$0xff] }
  0x2b   :  { %734 = vmatpush3.bf16.msra.mxu1 %v733_v63  ;;  %v133_v53 = vld [vmem:[%s1215_s1 + $0x360] sm:$0xff]  ;;  %v134_v55 = vld [vmem:[%s1215_s1 + $0x368] sm:$0xff]  ;;  %v151_v58 = vld [vmem:[%s1215_s1 + $0x3f0] sm:$0xff]  ;;  %v721_v60 = vpack.c.bf16 %v102_v52, %v101_v51  ;;  %v723_v62 = vpack.c.bf16 %v120_v57, %v119_v56 }
  0x2c   :  { %736 = vmatprep.subr.bf16.mxu1 %v735_v4  ;;  %v152_v59 = vld [vmem:[%s1215_s1 + $0x3f8] sm:$0xff]  ;;  %v753_v61 = vpack.c.bf16 %v134_v55, %v133_v53  ;;  %v103_v63 = vld [vmem:[%s1215_s1 + $0x270] sm:$0xff]  ;;  %v21_v6 = vld [vmem:[%s1216_s0 + $0x20] sm:$0xff] }
  0x2d   :  { %706 = vmatpush3.bf16.msra.mxu0 %v705_v10  ;;  %v104_v0 = vld [vmem:[%s1215_s1 + $0x278] sm:$0xff]  ;;  %v755_v1 = vpack.c.bf16 %v152_v59, %v151_v58  ;;  %v135_v2 = vld [vmem:[%s1215_s1 + $0x370] sm:$0xff]  ;;  %v490_v9 = vld [vmem:[%s1217_s2] ss:$0 sm:$0xff] }
  0x2e   :  { %708 = vmatprep.subr.bf16.mxu0 %v707_v12  ;;  %v136_v3 = vld [vmem:[%s1215_s1 + $0x378] sm:$0xff]  ;;  %v725_v4 = vpack.c.bf16 %v104_v0, %v103_v63  ;;  %v23_v7 = vld [vmem:[%s1216_s0 + $0x30] sm:$0xff]  ;;  %v459_v27 = vld [vmem:[%s1218_s3] sm:$0xff] }
  0x2f   :  { %738 = vmatpush3.bf16.msra.mxu1 %v737_v11  ;;  %v757_v5 = vpack.c.bf16 %v136_v3, %v135_v2 }
  0x30   :  { %740 = vmatprep.subr.bf16.mxu1 %v739_v16 }
  0x31   :  { %710 = vmatpush3.bf16.msra.mxu0 %v709_v22 }
  0x32   :  { %712 = vmatprep.subr.bf16.mxu0 %v711_v26  ;;  %v768_v26 = vmov 0  }
  0x33   :  { %742 = vmatpush3.bf16.msra.mxu1 %v741_v25  ;;  %760 = vset.pattern.permute.xlu1 %v768_v26 }
  0x34   :  { %744 = vmatprep.subr.bf16.mxu1 %v743_v30  ;;  %761 = vset.pattern.permute.xlu0 %v768_v26 }
  0x35   :  { %714 = vmatpush3.bf16.msra.mxu0 %v713_v36  ;;  %466 = vperm.xlu1 %760, %v459_v27   ;;  %v460_v36 = vlaneseq }
  0x36   :  { %716 = vmatprep.subr.bf16.mxu0 %v715_v38 }
  0x37   :  { %746 = vmatpush3.bf16.msra.mxu1 %v745_v37  ;;  %v461_v40 = vand.u32 127, %v460_v36 }
  0x38   :  { %748 = vmatprep.subr.bf16.mxu1 %v747_v42 }
  0x39   :  { %718 = vmatpush3.bf16.msra.mxu0 %v717_v48 }
  0x3a   :  { %720 = vmatprep.subr.bf16.mxu0 %v719_v50 }
  0x3b   :  { %750 = vmatpush3.bf16.msra.mxu1 %v749_v49 }
  0x3c   :  { %752 = vmatprep.subr.bf16.mxu1 %v751_v54 }
  0x3d   :  { %722 = vmatpush3.bf16.msra.mxu0 %v721_v60 }
  0x3e   :  { %724 = vmatprep.subr.bf16.mxu0 %v723_v62 }
  0x3f   :  { %754 = vmatpush3.bf16.msra.mxu1 %v753_v61 }
  0x40   :  { %756 = vmatprep.subr.bf16.mxu1 %v755_v1 }
  0x41   :  { %726 = vmatpush3.bf16.msra.mxu0 %v725_v4 }
  0x43   :  { %758 = vmatpush3.bf16.msra.mxu1 %v757_v5 }
  0x44   :  { %365 = vmatmul.mubr.f32.vlgmr.msra.gmra.mrb[2].mxu0 %v21_v6 }
  0x46   :  { %435 = vmatmul.mubr.f32.vlgmr.msra.gmra.mrb[2].mxu1 %v23_v7 }
  0xb4   :  { %v467_v41 = vpop.permute.xlu1 %466 }
  0xb5   :  { %vm468_vm1 = vcmp.eq.s32.totalorder %v461_v40, %v467_v41 }
  0xf7   :  { %v523_v8 = vpop.f32.mrb[0].mxu0 }
  0xf8   :  { %v524_v10 = vpop.f32.mrb[1].mxu0 }
  0xf9   :  { %v558_v11 = vpop.f32.mrb[0].mxu1  ;;  %v525_v12 = vadd.f32 %v524_v10, %v523_v8 }
  0xfa   :  { %v559_v13 = vpop.f32.mrb[1].mxu1 }
  0xfb   :  { %v560_v14 = vadd.f32 %v559_v13, %v558_v11  ;;  %v227_v15 = vadd.f32 %v525_v12, %v490_v9 }
  0xfd   :  { %v297_v16 = vadd.f32 %v560_v14, %v227_v15 }
 0x117   :  { %v593_v17 = vpop.f32.mrb[2].mxu0 }
 0x118   :  { %v594_v18 = vpop.f32.mrb[3].mxu0 }
 0x119   :  { %v628_v19 = vpop.f32.mrb[2].mxu1  ;;  %v595_v20 = vadd.f32 %v594_v18, %v593_v17 }
 0x11a   :  { %v629_v21 = vpop.f32.mrb[3].mxu1 }
 0x11b   :  { %v630_v22 = vadd.f32 %v629_v21, %v628_v19  ;;  %v367_v23 = vadd.f32 %v595_v20, %v297_v16 }
 0x11d   :  { %v437_v24 = vadd.f32 %v630_v22, %v367_v23 }
 0x11f   :  { %v441_v25 = vsel %vm440_vm0, %v437_v24, -inf }
 0x120   :  { %442 = vmax.xlane.f32.xlu0 %v441_v25 }
 0x1ad   :  { %v443_v28 = vpop.xlane.xlu0 %442 }
 0x1ae   :  { %v444_v29 = vsub.f32 %v437_v24, %v443_v28 }
 0x1b0   :  { %v445_v30 = vmul.f32 1.442695, %v444_v29 }
 0x1b2   :  { %762 = vpow2.f32 %v445_v30 }
 0x1bc   :  { %v763_v31 = vpop.eup %762 }
 0x1bd   :  { %v447_v32 = vsel %vm440_vm0, %v763_v31, 0.0 }
 0x1be   :  { %448 = vadd.xlane.f32.xlu0 %v447_v32 }
 0x24b   :  { %v449_v33 = vpop.xlane.xlu0 %448 }
 0x24c   :  { %764 = vlog2.f32 %v449_v33 }
 0x24d   :  { %766 = vrcp.f32 %v449_v33 }
 0x256   :  { %v765_v34 = vpop.eup %764 }
 0x257   :  { %v767_v35 = vpop.eup %766  ;;  %v451_v38 = vmul.f32 0.6931472, %v765_v34 }
 0x258   :  { %v454_v37 = vmul.f32 %v767_v35, %v763_v31 }
 0x259   :  { %v452_v43 = vsub.f32 %v444_v29, %v451_v38 }
 0x25a   :  { %v455_v39 = vsub.f32 1.0, %v454_v37 }
 0x25c   :  { %v456_v42 = vmax.f32 %v455_v39, 0.0 }
 0x25e   :  { %v457_v44 = vmul.f32 %v456_v42, %v456_v42 }
 0x260   :  { %v458_v45 = vmul.f32 %v457_v44, %v452_v43 }
 0x262   :  { %v462_v46 = vsel %vm440_vm0, %v458_v45, 0.0  ;;  %v469_v47 = vsel %vm468_vm1, %v458_v45, 0.0 }
 0x263   :  { %463 = vadd.xlane.f32.xlu1 %v462_v46  ;;  %v470_v48 = vsel %vm440_vm0, %v469_v47, 0.0 }
 0x264   :  { %471 = vadd.xlane.f32.xlu0 %v470_v48 }
 0x2f0   :  { %v464_v49 = vpop.xlane.xlu1 %463 }
 0x2f1   :  { %v473_v50 = vmul.f32 0.011111111, %v464_v49  ;;  %v472_v51 = vpop.xlane.xlu0 %471 }
 0x2f2   :  { %v474_v52 = vmul.f32 0.88888884, %v472_v51 }
 0x2f4   :  { %v475_v53 = vadd.f32 %v474_v52, %v473_v50 }
 0x2f6   :  { %v476_v54 = vsub.f32 0.0, %v475_v53 }
 0x2f8   :  { %485 = vst.msk [vmem:[%s1219_s4] sm:$0xff] %vm484_vm2, %v476_v54 }

</bundles_post_ra>
